<compile_context>
chip_gen: v7x
topology: tpu7x:2x2x1
jax: 0.10.0
libtpu: 0.0.40
codegen_flags: <defaults>
</compile_context>

<pallas_src>
import jax
import jax.numpy as jnp
from jax.experimental import pallas as pl
from jax.experimental.pallas import tpu as pltpu


def _round_up(x, m):
    return ((x + m - 1) // m) * m


def _choose_tiling(HW, tile_hw, N):
    """Pick (HW_pad, tile): tile is a multiple of 128 dividing HW_pad, padding
    waste is at most ~one 128-lane group per tile (not a full tile), and the
    total grid has >=2 steps when possible so both v7x TensorCores get work."""
    HW_128 = _round_up(HW, 128)
    cap = max(128, _round_up(min(tile_hw, HW_128), 128))
    n_tiles = -(-HW_128 // cap)
    if N * n_tiles < 2 and HW_128 >= 2 * 128:
        n_tiles = 2                      # feed both TensorCores on v7x
    tile = _round_up(-(-HW_128 // n_tiles), 128)
    return tile * n_tiles, tile


def _pixelconvres_kernel(x_ref, w1_ref, b1_ref, w2_ref, b2_ref,
                         w3_ref, b3_ref, o_ref):
    x = x_ref[...]                                   # (C, T) f32
    w1 = w1_ref[...]                                 # (h1, C) f32
    c_in = x.shape[0]

    # ---- layer 1 (C -> h1) on the VPU.  K=4 is far too small for the MXU:
    # four broadcast multiply-adds over (h1, T), exact f32.
    acc = w1[:, 0:1] * x[0:1, :]                     # (h1,1)*(1,T) -> (h1,T)
    for i in range(1, c_in):                         # static, unrolled
        acc = acc + w1[:, i:i + 1] * x[i:i + 1, :]
    h = jnp.maximum(acc + b1_ref[...], 0.0)          # ReLU, (h1, T) f32

    # ---- layer 2 (h1 -> h2) on the MXU: the only layer with enough K/M to
    # justify it.  bf16 operands, f32 accumulation; elementwise stays f32.
    h = jnp.dot(w2_ref[...], h.astype(jnp.bfloat16),
                preferred_element_type=jnp.float32)
    h = jnp.maximum(h + b2_ref[...], 0.0)            # ReLU, (h2, T) f32

    # ---- layer 3 (h2 -> 2) on VPU + XLU: per output channel a weighted
    # cross-sublane reduction of h (<1% MXU utilization otherwise).
    w3 = w3_ref[...]                                 # (h2, c_out) f32
    c_out = w3.shape[1]
    rows = [jnp.sum(w3[:, o:o + 1] * h, axis=0, keepdims=True)   # (1, T)
            for o in range(c_out)]                   # static, unrolled
    y = jnp.concatenate(rows, axis=0)                # (c_out, T) f32
    y = jnp.tanh(y + b3_ref[...])                    # final Tanh (EUP)

    # residual: + x[:, 0:2] in NCHW == first two sublanes here (exact f32).
    o_ref[...] = (y + x[0:c_out, :]).astype(o_ref.dtype)


def pixel_conv_res(x_nchw, params, *, tile_hw=8192):
    """x_nchw: (N, C, H, W) float32.  params: dict of w1,b1,w2,b2,w3,b3 stored
    as (in, out) / (1, out); repacked here to the kernel layout."""
    N, C, H, W = x_nchw.shape

    # Weight packing (tiny arrays).  VPU layers stay f32; MXU layer is bf16.
    w1 = jnp.transpose(params["w1"]).astype(jnp.float32)     # (h1, C)
    w2 = jnp.transpose(params["w2"]).astype(jnp.bfloat16)    # (h2, h1)
    w3t = params["w3"].astype(jnp.float32)                   # (h2, c_out)
    b1 = params["b1"].reshape(-1, 1).astype(jnp.float32)     # (h1, 1)
    b2 = params["b2"].reshape(-1, 1).astype(jnp.float32)     # (h2, 1)
    b3 = params["b3"].reshape(-1, 1).astype(jnp.float32)     # (c_out, 1)

    h1, c_in = w1.shape
    h2 = w2.shape[0]
    c_out = w3t.shape[1]
    assert c_in == C and c_out == 2, "residual x[:, 0:2] requires out_channels == 2"

    # Flatten spatial dims; pick a big HW tile with near-zero padding waste.
    HW = H * W
    HW_pad, tile = _choose_tiling(HW, tile_hw, N)
    x3 = x_nchw.reshape(N, C, HW)
    if HW_pad != HW:
        x3 = jnp.pad(x3, ((0, 0), (0, 0), (0, HW_pad - HW)))

    grid = (N, HW_pad // tile)

    cost = pl.CostEstimate(
        flops=2 * (C * h1 + h1 * h2 + h2 * c_out) * N * HW,
        transcendentals=c_out * N * HW,
        bytes_accessed=4 * (C + c_out) * N * HW,
    )

    out3 = pl.pallas_call(
        _pixelconvres_kernel,
        out_shape=jax.ShapeDtypeStruct((N, c_out, HW_pad), x_nchw.dtype),
        grid_spec=pltpu.PrefetchScalarGridSpec(
            num_scalar_prefetch=0,
            grid=grid,
            in_specs=[
                # x tile: batch squeezed, channels on sublanes, pixels on lanes.
                pl.BlockSpec((pl.Squeezed(), C, tile), lambda n, i: (n, 0, i)),
                # Weights/biases: constant index_map -> DMA'd once, kept
                # resident in VMEM across every grid step.
                pl.BlockSpec((h1, C), lambda n, i: (0, 0)),       # w1
                pl.BlockSpec((h1, 1), lambda n, i: (0, 0)),       # b1
                pl.BlockSpec((h2, h1), lambda n, i: (0, 0)),      # w2
                pl.BlockSpec((h2, 1), lambda n, i: (0, 0)),       # b2
                pl.BlockSpec((h2, c_out), lambda n, i: (0, 0)),   # w3 (in,out)
                pl.BlockSpec((c_out, 1), lambda n, i: (0, 0)),    # b3
            ],
            out_specs=pl.BlockSpec((pl.Squeezed(), c_out, tile),
                                   lambda n, i: (n, 0, i)),
        ),
        compiler_params=pltpu.CompilerParams(
            dimension_semantics=("parallel", "parallel")),
        cost_estimate=cost,
    )(x3, w1, b1, w2, b2, w3t, b3)

    # (N, 2, HW_pad) -> NCHW (slice off padding; reshape is free).
    return out3[:, :, :HW].reshape(N, c_out, H, W)


def _reference(x_nchw, params):
    """Pure-JAX f32 reference of the PyTorch forward pass (for validation)."""
    N, C, H, W = x_nchw.shape
    x2d = jnp.transpose(x_nchw, (0, 2, 3, 1)).reshape(-1, C).astype(jnp.float32)
    h = jnp.maximum(x2d @ params["w1"] + params["b1"], 0.0)
    h = jnp.maximum(h @ params["w2"] + params["b2"], 0.0)
    y = jnp.tanh(h @ params["w3"] + params["b3"])
    y = y + x2d[:, 0:2]
    return jnp.transpose(y.reshape(N, H, W, 2), (0, 3, 1, 2)).astype(x_nchw.dtype)


def init_params(key, in_channels, hidden, out_channels):
    """Deterministic synthetic weights, stored as (in, out) for x @ W."""
    dims = [in_channels] + hidden + [out_channels]
    params = {}
    for idx, (din, dout) in enumerate(zip(dims[:-1], dims[1:]), start=1):
        key, kw, kb = jax.random.split(key, 3)
        scale = 1.0 / jnp.sqrt(jnp.float32(din))
        params[f"w{idx}"] = (jax.random.uniform(kw, (din, dout), jnp.float32,
                                                -1.0, 1.0) * scale)
        params[f"b{idx}"] = (jax.random.uniform(kb, (1, dout), jnp.float32,
                                                -1.0, 1.0) * scale)
    return params


if __name__ == "__main__":
    # PixelConvRes(in_channels=4, out_channels=2, hidden=[32, 32])
    key = jax.random.PRNGKey(0)
    key, kx = jax.random.split(key)

    N, C, H, W = 2, 4, 16, 16
    hidden = [32, 32]
    out_channels = 2

    x = jax.random.normal(kx, (N, C, H, W), jnp.float32)
    params = init_params(key, C, hidden, out_channels)

    out = jax.jit(pixel_conv_res)(x, params)
    out = jax.block_until_ready(out)

    ref = _reference(x, params)
    assert out.shape == (N, out_channels, H, W)
    # Only layer 2 uses bf16 MXU operands (layers 1/3 are exact f32 on VPU);
    # tolerance kept relaxed vs. the f32 reference.
    assert jnp.allclose(out, ref, atol=5e-2, rtol=1e-3), (
        float(jnp.max(jnp.abs(out - ref))))

    print("KERNEL_OK")
</pallas_src>

<mosaic_0001>
module attributes {stable_mosaic.version = 11 : i64} {
  func.func @_pixelconvres_kernel(%arg0: i32, %arg1: i32, %arg2: memref<1x4x256xf32, #tpu.memory_space<vmem>>, %arg3: memref<32x4xf32, #tpu.memory_space<vmem>>, %arg4: memref<32x1xf32, #tpu.memory_space<vmem>>, %arg5: memref<32x32xbf16, #tpu.memory_space<vmem>>, %arg6: memref<32x1xf32, #tpu.memory_space<vmem>>, %arg7: memref<32x2xf32, #tpu.memory_space<vmem>>, %arg8: memref<2x1xf32, #tpu.memory_space<vmem>>, %arg9: memref<1x2x256xf32, #tpu.memory_space<vmem>>) attributes {dimension_semantics = [#tpu.dimension_semantics<parallel>, #tpu.dimension_semantics<parallel>], iteration_bounds = array<i64: 2, 1>, scalar_prefetch = 0 : i64, scratch_operands = 0 : i64, tpu.core_type = #tpu.core_type<tc>, window_params = [{transform_indices = @transform_0, window_bounds = array<i64: 1, 4, 256>}, {pipeline_mode = #tpu.pipeline_mode<synchronous>, transform_indices = @transform_1, window_bounds = array<i64: 32, 4>}, {pipeline_mode = #tpu.pipeline_mode<synchronous>, transform_indices = @transform_2, window_bounds = array<i64: 32, 1>}, {pipeline_mode = #tpu.pipeline_mode<synchronous>, transform_indices = @transform_3, window_bounds = array<i64: 32, 32>}, {pipeline_mode = #tpu.pipeline_mode<synchronous>, transform_indices = @transform_4, window_bounds = array<i64: 32, 1>}, {pipeline_mode = #tpu.pipeline_mode<synchronous>, transform_indices = @transform_5, window_bounds = array<i64: 32, 2>}, {pipeline_mode = #tpu.pipeline_mode<synchronous>, transform_indices = @transform_6, window_bounds = array<i64: 2, 1>}, {transform_indices = @transform_7, window_bounds = array<i64: 1, 2, 256>}]} {
    %c0 = arith.constant 0 : index
    %c0_0 = arith.constant 0 : index
    %c0_1 = arith.constant 0 : index
    %0 = vector.load %arg2[%c0, %c0_0, %c0_1] : memref<1x4x256xf32, #tpu.memory_space<vmem>>, vector<1x4x256xf32>
    %1 = vector.shape_cast %0 : vector<1x4x256xf32> to vector<4x256xf32>
    %c0_2 = arith.constant 0 : index
    %c0_3 = arith.constant 0 : index
    %2 = vector.load %arg3[%c0_2, %c0_3] : memref<32x4xf32, #tpu.memory_space<vmem>>, vector<32x4xf32>
    %3 = vector.extract_strided_slice %2 {offsets = [0, 0], sizes = [32, 1], strides = [1, 1]} : vector<32x4xf32> to vector<32x1xf32>
    %4 = vector.extract_strided_slice %1 {offsets = [0, 0], sizes = [1, 256], strides = [1, 1]} : vector<4x256xf32> to vector<1x256xf32>
    %5 = vector.broadcast %3 : vector<32x1xf32> to vector<32x256xf32>
    %6 = vector.broadcast %4 : vector<1x256xf32> to vector<32x256xf32>
    %7 = arith.mulf %5, %6 : vector<32x256xf32>
    %8 = vector.extract_strided_slice %2 {offsets = [0, 1], sizes = [32, 1], strides = [1, 1]} : vector<32x4xf32> to vector<32x1xf32>
    %9 = vector.extract_strided_slice %1 {offsets = [1, 0], sizes = [1, 256], strides = [1, 1]} : vector<4x256xf32> to vector<1x256xf32>
    %10 = vector.broadcast %8 : vector<32x1xf32> to vector<32x256xf32>
    %11 = vector.broadcast %9 : vector<1x256xf32> to vector<32x256xf32>
    %12 = arith.mulf %10, %11 : vector<32x256xf32>
    %13 = arith.addf %7, %12 : vector<32x256xf32>
    %14 = vector.extract_strided_slice %2 {offsets = [0, 2], sizes = [32, 1], strides = [1, 1]} : vector<32x4xf32> to vector<32x1xf32>
    %15 = vector.extract_strided_slice %1 {offsets = [2, 0], sizes = [1, 256], strides = [1, 1]} : vector<4x256xf32> to vector<1x256xf32>
    %16 = vector.broadcast %14 : vector<32x1xf32> to vector<32x256xf32>
    %17 = vector.broadcast %15 : vector<1x256xf32> to vector<32x256xf32>
    %18 = arith.mulf %16, %17 : vector<32x256xf32>
    %19 = arith.addf %13, %18 : vector<32x256xf32>
    %20 = vector.extract_strided_slice %2 {offsets = [0, 3], sizes = [32, 1], strides = [1, 1]} : vector<32x4xf32> to vector<32x1xf32>
    %21 = vector.extract_strided_slice %1 {offsets = [3, 0], sizes = [1, 256], strides = [1, 1]} : vector<4x256xf32> to vector<1x256xf32>
    %22 = vector.broadcast %20 : vector<32x1xf32> to vector<32x256xf32>
    %23 = vector.broadcast %21 : vector<1x256xf32> to vector<32x256xf32>
    %24 = arith.mulf %22, %23 : vector<32x256xf32>
    %25 = arith.addf %19, %24 : vector<32x256xf32>
    %c0_4 = arith.constant 0 : index
    %c0_5 = arith.constant 0 : index
    %26 = vector.load %arg4[%c0_4, %c0_5] : memref<32x1xf32, #tpu.memory_space<vmem>>, vector<32x1xf32>
    %27 = vector.broadcast %26 : vector<32x1xf32> to vector<32x256xf32>
    %28 = arith.addf %25, %27 : vector<32x256xf32>
    %cst = arith.constant 0.000000e+00 : f32
    %29 = vector.broadcast %cst : f32 to vector<32x256xf32>
    %30 = arith.maximumf %28, %29 : vector<32x256xf32>
    %c0_6 = arith.constant 0 : index
    %c0_7 = arith.constant 0 : index
    %31 = vector.load %arg5[%c0_6, %c0_7] : memref<32x32xbf16, #tpu.memory_space<vmem>>, vector<32x32xbf16>
    %32 = arith.truncf %30 : vector<32x256xf32> to vector<32x256xbf16>
    %cst_8 = arith.constant dense<0.000000e+00> : vector<32x256xf32>
    %33 = tpu.matmul %31, %32, %cst_8 {dimension_numbers = #tpu.dot_dimension_numbers<[1], [0], [0], [1], [0, 0, 1, 1], [], []>} : vector<32x32xbf16>, vector<32x256xbf16>, vector<32x256xf32> -> vector<32x256xf32>
    %c0_9 = arith.constant 0 : index
    %c0_10 = arith.constant 0 : index
    %34 = vector.load %arg6[%c0_9, %c0_10] : memref<32x1xf32, #tpu.memory_space<vmem>>, vector<32x1xf32>
    %35 = vector.broadcast %34 : vector<32x1xf32> to vector<32x256xf32>
    %36 = arith.addf %33, %35 : vector<32x256xf32>
    %cst_11 = arith.constant 0.000000e+00 : f32
    %37 = vector.broadcast %cst_11 : f32 to vector<32x256xf32>
    %38 = arith.maximumf %36, %37 : vector<32x256xf32>
    %c0_12 = arith.constant 0 : index
    %c0_13 = arith.constant 0 : index
    %39 = vector.load %arg7[%c0_12, %c0_13] : memref<32x2xf32, #tpu.memory_space<vmem>>, vector<32x2xf32>
    %40 = vector.extract_strided_slice %39 {offsets = [0, 0], sizes = [32, 1], strides = [1, 1]} : vector<32x2xf32> to vector<32x1xf32>
    %41 = vector.broadcast %40 : vector<32x1xf32> to vector<32x256xf32>
    %42 = arith.mulf %41, %38 : vector<32x256xf32>
    %cst_14 = arith.constant dense<0.000000e+00> : vector<256xf32>
    %43 = vector.multi_reduction <add>, %42, %cst_14 [0] : vector<32x256xf32> to vector<256xf32>
    %44 = vector.shape_cast %43 : vector<256xf32> to vector<1x256xf32>
    %45 = vector.extract_strided_slice %39 {offsets = [0, 1], sizes = [32, 1], strides = [1, 1]} : vector<32x2xf32> to vector<32x1xf32>
    %46 = vector.broadcast %45 : vector<32x1xf32> to vector<32x256xf32>
    %47 = arith.mulf %46, %38 : vector<32x256xf32>
    %cst_15 = arith.constant dense<0.000000e+00> : vector<256xf32>
    %48 = vector.multi_reduction <add>, %47, %cst_15 [0] : vector<32x256xf32> to vector<256xf32>
    %49 = vector.shape_cast %48 : vector<256xf32> to vector<1x256xf32>
    %50 = tpu.concatenate %44, %49 in 0 : vector<1x256xf32>, vector<1x256xf32> -> vector<2x256xf32>
    %c0_16 = arith.constant 0 : index
    %c0_17 = arith.constant 0 : index
    %51 = vector.load %arg8[%c0_16, %c0_17] : memref<2x1xf32, #tpu.memory_space<vmem>>, vector<2x1xf32>
    %52 = vector.broadcast %51 : vector<2x1xf32> to vector<2x256xf32>
    %53 = arith.addf %50, %52 : vector<2x256xf32>
    %54 = math.tanh %53 : vector<2x256xf32>
    %55 = vector.extract_strided_slice %1 {offsets = [0, 0], sizes = [2, 256], strides = [1, 1]} : vector<4x256xf32> to vector<2x256xf32>
    %56 = arith.addf %54, %55 : vector<2x256xf32>
    %c0_18 = arith.constant 0 : index
    %c0_19 = arith.constant 0 : index
    %c0_20 = arith.constant 0 : index
    %57 = vector.load %arg9[%c0_18, %c0_19, %c0_20] : memref<1x2x256xf32, #tpu.memory_space<vmem>>, vector<1x2x256xf32>
    %58 = vector.shape_cast %57 : vector<1x2x256xf32> to vector<2x256xf32>
    %59 = vector.shape_cast %56 : vector<2x256xf32> to vector<1x2x256xf32>
    tpu.vector_store %arg9[%c0_18, %c0_19, %c0_20], %59 {strides = array<i32>} : memref<1x2x256xf32, #tpu.memory_space<vmem>>, vector<1x2x256xf32>,
    return
  }
  func.func @transform_0(%arg0: i32, %arg1: i32) -> (i32, i32, i32) {
    %c0_i32 = arith.constant 0 : i32
    %c0_i32_0 = arith.constant 0 : i32
    return %arg0, %c0_i32, %arg1 : i32, i32, i32
  }
  func.func @transform_1(%arg0: i32, %arg1: i32) -> (i32, i32) {
    %c0_i32 = arith.constant 0 : i32
    %c0_i32_0 = arith.constant 0 : i32
    %c0_i32_1 = arith.constant 0 : i32
    return %c0_i32, %c0_i32_0 : i32, i32
  }
  func.func @transform_2(%arg0: i32, %arg1: i32) -> (i32, i32) {
    %c0_i32 = arith.constant 0 : i32
    %c0_i32_0 = arith.constant 0 : i32
    %c0_i32_1 = arith.constant 0 : i32
    return %c0_i32, %c0_i32_0 : i32, i32
  }
  func.func @transform_3(%arg0: i32, %arg1: i32) -> (i32, i32) {
    %c0_i32 = arith.constant 0 : i32
    %c0_i32_0 = arith.constant 0 : i32
    %c0_i32_1 = arith.constant 0 : i32
    return %c0_i32, %c0_i32_0 : i32, i32
  }
  func.func @transform_4(%arg0: i32, %arg1: i32) -> (i32, i32) {
    %c0_i32 = arith.constant 0 : i32
    %c0_i32_0 = arith.constant 0 : i32
    %c0_i32_1 = arith.constant 0 : i32
    return %c0_i32, %c0_i32_0 : i32, i32
  }
  func.func @transform_5(%arg0: i32, %arg1: i32) -> (i32, i32) {
    %c0_i32 = arith.constant 0 : i32
    %c0_i32_0 = arith.constant 0 : i32
    %c0_i32_1 = arith.constant 0 : i32
    return %c0_i32, %c0_i32_0 : i32, i32
  }
  func.func @transform_6(%arg0: i32, %arg1: i32) -> (i32, i32) {
    %c0_i32 = arith.constant 0 : i32
    %c0_i32_0 = arith.constant 0 : i32
    %c0_i32_1 = arith.constant 0 : i32
    return %c0_i32, %c0_i32_0 : i32, i32
  }
  func.func @transform_7(%arg0: i32, %arg1: i32) -> (i32, i32, i32) {
    %c0_i32 = arith.constant 0 : i32
    %c0_i32_0 = arith.constant 0 : i32
    return %arg0, %c0_i32, %arg1 : i32, i32, i32
  }
}

</mosaic_0001>

<bundles_post_ra>
// kernel: pixel_conv_res.1
= control target key start
LH: loop header
LB: loop body
LE: loop exit
PB: predicated region body
PF: predicated region fallthrough
CT: control target
= control target key end

     0   :  { %s1021_s24 = smov 0   ;;  %s1023_s25 = smov 0   ;;  %s1136_s0 = inlined_call_operand.vmem [shape: f32[2,4,256], index: 0, kind: input, shape index: {}]   ;;  %s1137_s1 = inlined_call_operand.vmem [shape: f32[32,4], index: 1, kind: input, shape index: {}]   ;;  %s1138_s2 = inlined_call_operand.vmem [shape: f32[32,1], index: 2, kind: input, shape index: {}]   ;;  %s1139_s3 = inlined_call_operand.vmem [shape: bf16[32,32], index: 3, kind: input, shape index: {}]   ;;  %s1140_s4 = inlined_call_operand.vmem [shape: f32[32,1], index: 4, kind: input, shape index: {}]   ;;  %s1141_s5 = inlined_call_operand.vmem [shape: f32[32,2], index: 5, kind: input, shape index: {}]   ;;  %s1142_s6 = inlined_call_operand.vmem [shape: f32[2,1], index: 6, kind: input, shape index: {}]   ;;  %s1143_s7 = inlined_call_operand.vmem [shape: f32[2,2,256], index: 7, kind: output, shape index: {}]  }
   0x1   :  { %s1025_s26 = smov 0  }
   0x2 LB: > { %s29_s27 = sadd.s32 1, %s971_s25  ;;  %p883_p0 = scmp.ge.s32.totalorder %s975_s26, 1  ;;  %s975_s26 = sphi %s1025_s26, %s17_s26   ;;  %s971_s25 = sphi %s1023_s25, %s1145_s25   ;;  %s967_s24 = sphi %s1021_s24, %s1144_s24  }
   0x3   : > { %p31_p1 = scmp.ge.s32.totalorder %s29_s27, 2  ;;  %p258_p2 = scmp.lt.s32.totalorder %s975_s26, 3 }
   0x5   : > { %s1147_s27 = smov (%p31_p1, %s29_s27), 0  ;;  %p259_p3 = pnand %p883_p0, %p258_p2 }
   0x6   : > { %v320_v0 = vld [vmem:[%s1137_s1] sm:$0xff] (!%p259_p3)  ;;  %v977_v1 = vmov (!%p259_p3), 3   ;;  %v978_v2 = vmov (!%p259_p3), 1   ;;  %v321_v3 = vld [vmem:[%s1137_s1 + $0x8] sm:$0xff] (!%p259_p3)  ;;  %v979_v4 = vmov (!%p259_p3), 0   ;;  %v980_v5 = vmov (!%p259_p3), 2  }
   0x7   : > { %262 = sbr.rel (%p259_p3) target bundleno = 455 (0x1c7), region = 48  ;;  %933 = vset.pattern.permute.xlu0 (!%p259_p3), %v977_v1  ;;  %929 = vset.pattern.permute.xlu1 (!%p259_p3), %v978_v2  ;;  %v323_v6 = vld [vmem:[%s1137_s1 + $0x18] sm:$0xff] (!%p259_p3)  ;;  %v322_v7 = vld [vmem:[%s1137_s1 + $0x10] sm:$0xff] (!%p259_p3)  ;;  %v521_v8 = vld [vmem:[%s1138_s2] sm:$0xff] (!%p259_p3)  ;;  %p299_p4 = scmp.lt.s32.totalorder (!%p259_p3), %s967_s24, 1  ;;  %v345_v26 = vlaneseq (!%p259_p3)  ;;  %vm603_vm0 = vcmask (!%p259_p3), 261120  }
   0x8   : > { %472 = vperm.xlu0 (!%p259_p3), %933, %v320_v0   ;;  %372 = vperm.xlu1 (!%p259_p3), %929, %v320_v0   ;;  %v524_v9 = vld [vmem:[%s1138_s2 + $0x18] sm:$0xff] (!%p259_p3)  ;;  %v522_v10 = vld [vmem:[%s1138_s2 + $0x8] sm:$0xff] (!%p259_p3)  ;;  %v523_v11 = vld [vmem:[%s1138_s2 + $0x10] sm:$0xff] (!%p259_p3)  ;;  %vm763_vm1 = vcmask (!%p259_p3), 1040384  }
   0x9   : > { %642 = vmatprep.mubr.bf16.mxu0 (!%p259_p3), %v979_v4  ;;  %652 = vmatprep.mubr.bf16.mxu1 (!%p259_p3), %v979_v4  ;;  %v569_v12 = vld [vmem:[%s1140_s4] sm:$0xff] (!%p259_p3)  ;;  %v571_v13 = vld [vmem:[%s1140_s4 + $0x10] sm:$0xff] (!%p259_p3)  ;;  %v672_v15 = vld [vmem:[%s1141_s5 + $0x8] sm:$0xff] (!%p259_p3)  ;;  %v346_v28 = vshrl.u32 (!%p259_p3), %v345_v26, 7 }
   0xa   : > { %v671_v14 = vld [vmem:[%s1141_s5] sm:$0xff] (!%p259_p3)  ;;  %v570_v16 = vld [vmem:[%s1140_s4 + $0x8] sm:$0xff] (!%p259_p3)  ;;  %v572_v17 = vld [vmem:[%s1140_s4 + $0x18] sm:$0xff] (!%p259_p3) }
   0xb   : > { %v673_v18 = vld [vmem:[%s1141_s5 + $0x10] sm:$0xff] (!%p259_p3)  ;;  %v674_v19 = vld [vmem:[%s1141_s5 + $0x18] sm:$0xff] (!%p259_p3)  ;;  %v766_v20 = vld [vmem:[%s1142_s6] sm:$0x3] (!%p259_p3)  ;;  %v347_v30 = vsub.s32 (!%p259_p3), 0, %v346_v28  ;;  %v351_v31 = vsub.s32 (!%p259_p3), 4, %v346_v28 }
   0xc   : > { %934 = vset.pattern.permute.xlu0 (!%p259_p3), %v980_v5  ;;  %376 = vperm.xlu1 (!%p259_p3), %929, %v321_v3   ;;  %v389_v32 = vsub.s32 (!%p259_p3), 1, %v346_v28  ;;  %v393_v33 = vsub.s32 (!%p259_p3), 5, %v346_v28  ;;  %v439_v41 = vsub.s32 (!%p259_p3), 2, %v346_v28  ;;  %v443_v42 = vsub.s32 (!%p259_p3), 6, %v346_v28 }
   0xd   : > { %422 = vperm.xlu0 (!%p259_p3), %934, %v320_v0   ;;  %v489_v44 = vsub.s32 (!%p259_p3), 3, %v346_v28  ;;  %v493_v45 = vsub.s32 (!%p259_p3), 7, %v346_v28 }
   0xe   : > { %s1149_s24 = smov (!%p299_p4, %s967_s24), 1 }
   0xf   : > { %s895_s20 = sshll.u32 %s1149_s24, 3  ;;  %s896_s9 = sshll.u32 %s1149_s24, 2 }
  0x10   : > { %930 = vset.pattern.permute.xlu1 %v980_v5  ;;  %s306_s23 = scalar_lea.vmem %s1136_s0, %s895_s20  ;;  %s316_s12 = scalar_lea.vmem %s1143_s7, %s896_s9 }
  0x11   : > { %434 = vperm.xlu0 %934, %v323_v6   ;;  %426 = vperm.xlu1 %930, %v321_v3   ;;  %v1102_v35 = vld [vmem:[%s306_s23] sm:$0xff] }
  0x12   : > { %v348_v37 = vrot.slane %v1102_v35, %v347_v30  ;;  %v352_v38 = vrot.slane %v1102_v35, %v351_v31  ;;  %v390_v39 = vrot.slane %v1102_v35, %v389_v32  ;;  %v394_v40 = vrot.slane %v1102_v35, %v393_v33 }
  0x13   : > { %v440_v50 = vrot.slane %v1102_v35, %v439_v41  ;;  %v444_v51 = vrot.slane %v1102_v35, %v443_v42  ;;  %v490_v53 = vrot.slane %v1102_v35, %v489_v44  ;;  %v494_v54 = vrot.slane %v1102_v35, %v493_v45 }
  0x14   : > { %v358_v46 = vrot.slane %v348_v37, %v347_v30  ;;  %v362_v47 = vrot.slane %v352_v38, %v347_v30  ;;  %v400_v48 = vrot.slane %v390_v39, %v389_v32  ;;  %v404_v49 = vrot.slane %v394_v40, %v389_v32 }
  0x15   : > { %937 = vset.pattern.permute.xlu0 %v979_v4  ;;  %931 = vset.pattern.permute.xlu1 %v979_v4  ;;  %v450_v60 = vrot.slane %v440_v50, %v439_v41  ;;  %v454_v61 = vrot.slane %v444_v51, %v439_v41  ;;  %v500_v62 = vrot.slane %v490_v53, %v489_v44 }
  0x16   : > { %326 = vperm.xlu0 %937, %v320_v0   ;;  %336 = vperm.xlu1 %931, %v322_v7   ;;  %v504_v63 = vrot.slane %v494_v54, %v489_v44 }
  0x1a   : > { %331 = vperm.xlu0 %937, %v321_v3   ;;  %932 = vset.pattern.permute.xlu1 %v978_v2 }
  0x1b   : > { %380 = vperm.xlu1 %932, %v322_v7  }
  0x1e   : > { %341 = vperm.xlu0 %937, %v323_v6  }
  0x1f   : > { %384 = vperm.xlu1 %932, %v323_v6  }
  0x22   : > { %527 = vperm.xlu0 %937, %v521_v8  }
  0x23   : > { %935 = vset.pattern.permute.xlu1 %v977_v1 }
  0x24   : > { %476 = vperm.xlu1 %935, %v321_v3  }
  0x26   : > { %542 = vperm.xlu0 %937, %v524_v9  }
  0x28   : > { %936 = vset.pattern.permute.xlu1 %v980_v5 }
  0x29   : > { %430 = vperm.xlu1 %936, %v322_v7  }
  0x2a   : > { %941 = vset.pattern.permute.xlu0 %v978_v2 }
  0x2b   : > { %726 = vperm.xlu0 %941, %v672_v15  }
  0x2d   : > { %938 = vset.pattern.permute.xlu1 %v977_v1 }
  0x2e   : > { %480 = vperm.xlu1 %938, %v322_v7  }
  0x2f   : > { %942 = vset.pattern.permute.xlu0 %v979_v4 }
  0x30   : > { %580 = vperm.xlu0 %942, %v570_v16  }
  0x32   : > { %484 = vperm.xlu1 %938, %v323_v6  }
  0x34   : > { %590 = vperm.xlu0 %942, %v572_v17  }
  0x36   : > { %939 = vset.pattern.permute.xlu1 %v979_v4 }
  0x37   : > { %532 = vperm.xlu1 %939, %v522_v10  }
  0x38   : > { %682 = vperm.xlu0 %942, %v672_v15  }
  0x3b   : > { %537 = vperm.xlu1 %939, %v523_v11  }
  0x3c   : > { %692 = vperm.xlu0 %942, %v674_v19  }
  0x3f   : > { %575 = vperm.xlu1 %939, %v569_v12  }
  0x43   : > { %585 = vperm.xlu1 %939, %v571_v13  }
  0x47   : > { %677 = vperm.xlu1 %939, %v671_v14  }
  0x4b   : > { %940 = vset.pattern.permute.xlu1 %v978_v2 }
  0x4c   : > { %722 = vperm.xlu1 %940, %v671_v14  }
  0x50   : > { %943 = vset.pattern.permute.xlu1 %v979_v4 }
  0x51   : > { %687 = vperm.xlu1 %943, %v673_v18  }
  0x55   : > { %944 = vset.pattern.permute.xlu1 %v978_v2 }
  0x56   : > { %730 = vperm.xlu1 %944, %v673_v18  }
  0x5a   : > { %734 = vperm.xlu1 %944, %v674_v19  }
  0x5e   : > { %945 = vset.pattern.permute.xlu1 %v979_v4 }
  0x5f   : > { %769 = vperm.xlu1 %945, %v766_v20  }
  0x87   : > { %v373_v21 = vpop.permute.xlu1 %372  ;;  %v473_v22 = vpop.permute.xlu0 %472 }
  0x88   : > { %v405_v58 = vmul.f32 %v400_v48, %v373_v21  ;;  %v406_v59 = vmul.f32 %v404_v49, %v373_v21  ;;  %v505_v12 = vmul.f32 %v500_v62, %v473_v22  ;;  %v506_v13 = vmul.f32 %v504_v63, %v473_v22 }
  0x8b   : > { %v377_v23 = vpop.permute.xlu1 %376 }
  0x8c   : > { %v423_v24 = vpop.permute.xlu0 %422  ;;  %v407_v16 = vmul.f32 %v400_v48, %v377_v23  ;;  %v408_v17 = vmul.f32 %v404_v49, %v377_v23 }
  0x8d   : > { %v455_v0 = vmul.f32 %v450_v60, %v423_v24  ;;  %v456_v1 = vmul.f32 %v454_v61, %v423_v24 }
  0x90   : > { %v1093_v25 = vpop.permute.xlu1 %426  ;;  %v435_v29 = vpop.permute.xlu0 %434 }
  0x91   : > { %v461_v21 = vmul.f32 %v450_v60, %v435_v29  ;;  %v462_v24 = vmul.f32 %v454_v61, %v435_v29  ;;  %v458_v37 = vmul.f32 %v454_v61, %v1093_v25 }
  0x95   : > { %v337_v27 = vpop.permute.xlu1 %336  ;;  %v327_v36 = vpop.permute.xlu0 %326 }
  0x96   : > { %v363_v56 = vmul.f32 %v358_v46, %v327_v36  ;;  %v364_v57 = vmul.f32 %v362_v47, %v327_v36  ;;  %v367_v26 = vmul.f32 %v358_v46, %v337_v27  ;;  %v368_v28 = vmul.f32 %v362_v47, %v337_v27 }
  0x97   : > { %v457_v36 = vmul.f32 %v450_v60, %v1093_v25 }
  0x98   : > { %v413_v2 = vadd.f32 %v405_v58, %v363_v56  ;;  %v414_v3 = vadd.f32 %v406_v59, %v364_v57 }
  0x99   : > { %v332_v52 = vpop.permute.xlu0 %331 }
  0x9a   : > { %v381_v34 = vpop.permute.xlu1 %380  ;;  %v365_v6 = vmul.f32 %v358_v46, %v332_v52  ;;  %v366_v7 = vmul.f32 %v362_v47, %v332_v52  ;;  %v463_v14 = vadd.f32 %v455_v0, %v413_v2  ;;  %v464_v15 = vadd.f32 %v456_v1, %v414_v3 }
  0x9b   : > { %v409_v18 = vmul.f32 %v400_v48, %v381_v34  ;;  %v410_v19 = vmul.f32 %v404_v49, %v381_v34 }
  0x9c   : > { %v415_v30 = vadd.f32 %v407_v16, %v365_v6  ;;  %v416_v31 = vadd.f32 %v408_v17, %v366_v7  ;;  %v513_v22 = vadd.f32 %v505_v12, %v463_v14  ;;  %v514_v38 = vadd.f32 %v506_v13, %v464_v15  ;;  %v946_v17 = vld [vmem:[%s1139_s3] sm:$0xff]  }
  0x9d   : > { %v342_v4 = vpop.permute.xlu0 %341  ;;  %v417_v39 = vadd.f32 %v409_v18, %v367_v26  ;;  %v418_v40 = vadd.f32 %v410_v19, %v368_v28  ;;  %v947_v18 = vld [vmem:[%s1139_s3 + $0x8] sm:$0xff]  }
  0x9e   : > { %v385_v43 = vpop.permute.xlu1 %384  ;;  %v369_v8 = vmul.f32 %v358_v46, %v342_v4  ;;  %v370_v9 = vmul.f32 %v362_v47, %v342_v4  ;;  %v465_v47 = vadd.f32 %v457_v36, %v415_v30 }
  0x9f   : > { %v411_v10 = vmul.f32 %v400_v48, %v385_v43  ;;  %v412_v11 = vmul.f32 %v404_v49, %v385_v43  ;;  %v466_v48 = vadd.f32 %v458_v37, %v416_v31 }
  0xa1   : > { %v419_v32 = vadd.f32 %v411_v10, %v369_v8  ;;  %v420_v33 = vadd.f32 %v412_v11, %v370_v9  ;;  %v528_v23 = vpop.permute.xlu0 %527 }
  0xa2   : > { %v545_v49 = vadd.f32 %v528_v23, %v513_v22  ;;  %v546_v50 = vadd.f32 %v528_v23, %v514_v38 }
  0xa3   : > { %v477_v55 = vpop.permute.xlu1 %476  ;;  %v469_v45 = vadd.f32 %v461_v21, %v419_v32  ;;  %v470_v46 = vadd.f32 %v462_v24, %v420_v33 }
  0xa4   : > { %v507_v41 = vmul.f32 %v500_v62, %v477_v55  ;;  %v508_v34 = vmul.f32 %v504_v63, %v477_v55  ;;  %v554_v0 = vmax.f32 %v546_v50, 0.0 }
  0xa5   : > { %v543_v1 = vpop.permute.xlu0 %542 }
  0xa6   : > { %v515_v54 = vadd.f32 %v507_v41, %v465_v47  ;;  %v516_v56 = vadd.f32 %v508_v34, %v466_v48 }
  0xa8   : > { %v431_v5 = vpop.permute.xlu1 %430 }
  0xa9   : > { %v459_v43 = vmul.f32 %v450_v60, %v431_v5  ;;  %v460_v29 = vmul.f32 %v454_v61, %v431_v5  ;;  %v553_v61 = vmax.f32 %v545_v49, 0.0 }
  0xaa   : > { %v727_v21 = vpop.permute.xlu0 %726 }
  0xab   : > { %v467_v57 = vadd.f32 %v459_v43, %v417_v39  ;;  %v468_v58 = vadd.f32 %v460_v29, %v418_v40 }
  0xad   : > { %v481_v20 = vpop.permute.xlu1 %480 }
  0xae   : > { %v509_v51 = vmul.f32 %v500_v62, %v481_v20  ;;  %v510_v25 = vmul.f32 %v504_v63, %v481_v20 }
  0xaf   : > { %v581_v28 = vpop.permute.xlu0 %580 }
  0xb0   : > { %v517_v2 = vadd.f32 %v509_v51, %v467_v57  ;;  %v518_v3 = vadd.f32 %v510_v25, %v468_v58 }
  0xb1   : > { %v485_v42 = vpop.permute.xlu1 %484 }
  0xb2   : > { %v511_v44 = vmul.f32 %v500_v62, %v485_v42  ;;  %v512_v27 = vmul.f32 %v504_v63, %v485_v42 }
  0xb3   : > { %v591_v31 = vpop.permute.xlu0 %590 }
  0xb4   : > { %v519_v52 = vadd.f32 %v511_v44, %v469_v45  ;;  %v520_v53 = vadd.f32 %v512_v27, %v470_v46 }
  0xb6   : > { %v533_v55 = vpop.permute.xlu1 %532  ;;  %v551_v4 = vadd.f32 %v543_v1, %v519_v52  ;;  %v552_v5 = vadd.f32 %v543_v1, %v520_v53 }
  0xb7   : > { %v547_v59 = vadd.f32 %v533_v55, %v515_v54  ;;  %v548_v60 = vadd.f32 %v533_v55, %v516_v56  ;;  %v683_v47 = vpop.permute.xlu0 %682 }
  0xb8   : > { %v560_v13 = vmax.f32 %v552_v5, 0.0  ;;  %v559_v14 = vmax.f32 %v551_v4, 0.0 }
  0xb9   : > { %v555_v6 = vmax.f32 %v547_v59, 0.0  ;;  %v556_v7 = vmax.f32 %v548_v60, 0.0 }
  0xba   : > { %v538_v62 = vpop.permute.xlu1 %537 }
  0xbb   : > { %v549_v63 = vadd.f32 %v538_v62, %v517_v2  ;;  %v550_v8 = vadd.f32 %v538_v62, %v518_v3  ;;  %v566_v9 = vpack.c.bf16 %v556_v7, %v554_v0  ;;  %v565_v10 = vpack.c.bf16 %v555_v6, %v553_v61  ;;  %v693_v3 = vpop.permute.xlu0 %692 }
  0xbd   : > { %v557_v11 = vmax.f32 %v549_v63, 0.0  ;;  %v558_v12 = vmax.f32 %v550_v8, 0.0  ;;  %610 = vmatprep.subr.bf16.mxu0 %v566_v9  ;;  %897 = vmatprep.subr.bf16.mxu1 %v566_v9 }
  0xbe   : > { %611 = vmatpush1.bf16.msra.mxu0 %v565_v10  ;;  %899 = vmatpush1.bf16.msra.mxu1 %v565_v10  ;;  %v576_v19 = vpop.permute.xlu1 %575 }
  0xbf   : > { %v568_v15 = vpack.c.bf16 %v560_v13, %v558_v12  ;;  %v567_v16 = vpack.c.bf16 %v559_v14, %v557_v11 }
  0xc1   : > { %612 = vmatprep.subr.bf16.mxu0 %v568_v15  ;;  %898 = vmatprep.subr.bf16.mxu1 %v568_v15 }
  0xc2   : > { %613 = vmatpush1.bf16.msra.mxu0 %v567_v16  ;;  %900 = vmatpush1.bf16.msra.mxu1 %v567_v16  ;;  %v586_v20 = vpop.permute.xlu1 %585 }
  0xc5   : > { %890 = vmatmul.mubr.msk.bf16.vlgmr.msra.gmra.mrb[0].mxu0 %vm603_vm0, %v946_v17  ;;  %891 = vmatmul.mubr.msk.bf16.vlgmr.msra.gmra.mrb[0].mxu1 %vm603_vm0, %v947_v18 }
  0xc6   : > { %v678_v24 = vpop.permute.xlu1 %677 }
  0xcb   : > { %v723_v26 = vpop.permute.xlu1 %722 }
  0xd0   : > { %v688_v30 = vpop.permute.xlu1 %687 }
  0xd5   : > { %v731_v44 = vpop.permute.xlu1 %730 }
  0xd9   : > { %v735_v2 = vpop.permute.xlu1 %734 }
 0x198   : > { %v644_v32 = vpop.f32.mrb[0].mxu0  ;;  %v654_v33 = vpop.f32.mrb[0].mxu1 }
 0x199   : > { %v645_v36 = vadd.f32 %v644_v32, %v576_v19  ;;  %v646_v37 = vpop.f32.mrb[1].mxu0  ;;  %v656_v22 = vpop.f32.mrb[1].mxu1  ;;  %v655_v38 = vadd.f32 %v654_v33, %v586_v20 }
 0x19a   : > { %v647_v39 = vadd.f32 %v646_v37, %v576_v19  ;;  %v648_v40 = vpop.f32.mrb[2].mxu0  ;;  %v658_v23 = vpop.f32.mrb[2].mxu1  ;;  %v657_v41 = vadd.f32 %v656_v22, %v586_v20 }
 0x19b   : > { %v649_v34 = vadd.f32 %v648_v40, %v581_v28  ;;  %v650_v42 = vpop.f32.mrb[3].mxu0  ;;  %v660_v43 = vpop.f32.mrb[3].mxu1  ;;  %v663_v29 = vmax.f32 %v645_v36, 0.0  ;;  %v659_v27 = vadd.f32 %v658_v23, %v591_v31  ;;  %v667_v49 = vmax.f32 %v655_v38, 0.0 }
 0x19c   : > { %v651_v45 = vadd.f32 %v650_v42, %v581_v28  ;;  %v661_v46 = vadd.f32 %v660_v43, %v591_v31  ;;  %v664_v48 = vmax.f32 %v647_v39, 0.0  ;;  %v668_v50 = vmax.f32 %v657_v41, 0.0 }
 0x19d   : > { %v665_v51 = vmax.f32 %v649_v34, 0.0  ;;  %v695_v52 = vmul.f32 %v678_v24, %v663_v29  ;;  %v737_v53 = vmul.f32 %v723_v26, %v663_v29  ;;  %v669_v54 = vmax.f32 %v659_v27, 0.0  ;;  %v770_v29 = vpop.permute.xlu1 %769 }
 0x19e   : > { %v666_v25 = vmax.f32 %v651_v45, 0.0  ;;  %v670_v56 = vmax.f32 %v661_v46, 0.0  ;;  %v696_v57 = vmul.f32 %v678_v24, %v664_v48  ;;  %v699_v60 = vmul.f32 %v688_v30, %v667_v49 }
 0x19f   : > { %v697_v58 = vmul.f32 %v683_v47, %v665_v51  ;;  %v739_v55 = vmul.f32 %v727_v21, %v665_v51  ;;  %v738_v61 = vmul.f32 %v723_v26, %v664_v48  ;;  %v741_v0 = vmul.f32 %v731_v44, %v667_v49 }
 0x1a0   : > { %v698_v59 = vmul.f32 %v683_v47, %v666_v25  ;;  %v740_v1 = vmul.f32 %v727_v21, %v666_v25  ;;  %v700_v4 = vmul.f32 %v688_v30, %v668_v50  ;;  %v742_v62 = vmul.f32 %v731_v44, %v668_v50 }
 0x1a1   : > { %v703_v5 = vadd.f32 %v697_v58, %v695_v52  ;;  %v745_v6 = vadd.f32 %v739_v55, %v737_v53  ;;  %v701_v63 = vmul.f32 %v693_v3, %v669_v54  ;;  %v702_v9 = vmul.f32 %v693_v3, %v670_v56 }
 0x1a2   : > { %v712_v7 = vadd.f32 %v698_v59, %v696_v57  ;;  %v754_v8 = vadd.f32 %v740_v1, %v738_v61  ;;  %v743_v12 = vmul.f32 %v735_v2, %v669_v54  ;;  %v744_v14 = vmul.f32 %v735_v2, %v670_v56 }
 0x1a3   : > { %v704_v10 = vadd.f32 %v703_v5, %v699_v60  ;;  %v746_v13 = vadd.f32 %v745_v6, %v741_v0  ;;  %v776_v51 = vcombine.high %v1102_v35, %v1102_v35 }
 0x1a4   : > { %v713_v11 = vadd.f32 %v712_v7, %v700_v4  ;;  %v755_v15 = vadd.f32 %v754_v8, %v742_v62 }
 0x1a5   : > { %v705_v16 = vadd.f32 %v704_v10, %v701_v63  ;;  %v747_v18 = vadd.f32 %v746_v13, %v743_v12 }
 0x1a6   : > { %v714_v17 = vadd.f32 %v713_v11, %v702_v9  ;;  %v756_v19 = vadd.f32 %v755_v15, %v744_v14 }
 0x1a7   : > { %v706_v20 = vrot.slane %v705_v16, 4  ;;  %v748_v24 = vrot.slane %v747_v18, 4 }
 0x1a8   : > { %v715_v21 = vrot.slane %v714_v17, 4  ;;  %v757_v26 = vrot.slane %v756_v19, 4 }
 0x1a9   : > { %v707_v28 = vadd.f32 %v706_v20, %v705_v16  ;;  %v749_v31 = vadd.f32 %v748_v24, %v747_v18 }
 0x1aa   : > { %v716_v30 = vadd.f32 %v715_v21, %v714_v17  ;;  %v758_v32 = vadd.f32 %v757_v26, %v756_v19 }
 0x1ab   : > { %v708_v33 = vrot.slane %v707_v28, 2  ;;  %v750_v37 = vrot.slane %v749_v31, 2 }
 0x1ac   : > { %v717_v36 = vrot.slane %v716_v30, 2  ;;  %v759_v22 = vrot.slane %v758_v32, 2 }
 0x1ad   : > { %v751_v38 = vadd.f32 %v750_v37, %v749_v31  ;;  %v709_v39 = vadd.f32 %v708_v33, %v707_v28 }
 0x1ae   : > { %v718_v40 = vadd.f32 %v717_v36, %v716_v30  ;;  %v760_v23 = vadd.f32 %v759_v22, %v758_v32 }
 0x1af   : > { %v710_v41 = vrot.slane %v709_v39, 1  ;;  %v752_v42 = vrot.slane %v751_v38, 1 }
 0x1b0   : > { %v719_v34 = vrot.slane %v718_v40, 1  ;;  %v761_v43 = vrot.slane %v760_v23, 1 }
 0x1b1   : > { %v711_v44 = vadd.f32 %v710_v41, %v709_v39  ;;  %v753_v45 = vadd.f32 %v752_v42, %v751_v38 }
 0x1b2   : > { %v720_v27 = vadd.f32 %v719_v34, %v718_v40  ;;  %v762_v46 = vadd.f32 %v761_v43, %v760_v23 }
 0x1b3   : > { %v764_v47 = vsel %vm763_vm1, %v711_v44, %v753_v45 }
 0x1b4   : > { %v765_v48 = vsel %vm763_vm1, %v720_v27, %v762_v46  ;;  %v772_v49 = vadd.f32 %v770_v29, %v764_v47 }
 0x1b5   : > { %v773_v50 = vadd.f32 %v770_v29, %v765_v48 }
 0x1b6   : > { %949 = vtanh.f32 %v772_v49 }
 0x1b7   : > { %951 = vtanh.f32 %v773_v50 }
 0x1c0   : > { %v950_v25 = vpop.eup %949 }
 0x1c1   : > { %v952_v52 = vpop.eup %951  ;;  %v778_v53 = vadd.f32 %v950_v25, %v1102_v35 }
 0x1c2   : > { %v779_v54 = vadd.f32 %v952_v52, %v776_v51 }
 0x1c4   : > { %v782_v56 = vcombine.low %v778_v53, %v779_v54 }
 0x1c6   : > { %892 = vst.sshfl [vmem:[%s316_s12] sm:$0x33 pattern:$0x76325410] %v782_v56 }
 0x1c7 PF: > { %s17_s26 = sadd.s32 1, %s975_s26   ;;  %s1144_s24 = smov %s971_s25 }
 0x1c8   : > { %p14_p5 = scmp.ge.s32.totalorder %s17_s26, 4   ;;  %s1145_s25 = smov %s1147_s27 }
 0x1ca   :  { %16 = sbr.rel (!%p14_p5) target bundleno = 2 (0x2), region = 78 }

</bundles_post_ra>
